<compile_context>
chip_gen: v5e
topology: v5e:2x2
jax: 0.10.0
libtpu: 0.0.40
codegen_flags: <defaults>
</compile_context>

<pallas_src>
import jax
import jax.numpy as jnp
from jax.experimental import pallas as pl
from jax.experimental.pallas import tpu as pltpu


def _hook_kernel(xt_ref, out_ref):
    # xt_ref: (2, bn) f32, batch on lanes.  out_ref: (5, bn) f32.
    x0 = xt_ref[0:1, :]                      # (1, bn) sublane slice
    x1 = xt_ref[1:2, :]                      # (1, bn)
    # linear_1 with W1 = [[1,1],[1,1]], b1 = [1,1]: both columns = x0 + x1 + 1
    l1 = x0 + x1 + 1.0                       # pure VPU sublane add
    # linear_2 with W2 = [[1,1]], b2 = [1]: z = 2*l1 + 1
    l2 = l1 + l1 + 1.0
    r = jnp.maximum(l2, 0.0)                 # ReLU
    r6 = jnp.minimum(r, 6.0)                 # ReLU6 (input already >= 0)

    # Direct sub-ref stores (no concatenate, no XLU shifts).
    # Packed rows: [l1_col0, l1_col1, l2, relu, relu6]
    out_ref[0:1, :] = l1
    out_ref[1:2, :] = l1
    out_ref[2:3, :] = l2
    out_ref[3:4, :] = r
    out_ref[4:5, :] = r6


def _pick_block(B):
    """Largest lane-dense block width that divides B; else full array."""
    for cand in (8192, 4096, 2048, 1024, 512, 256, 128):
        if B % cand == 0:
            return cand
    return B


def test_for_hook_forward(x):
    """Replicates TestForHook.forward with deterministic all-ones params.

    x: (B, 2) float32.
    Returns (relu6, (x, linear_1, linear_2), (linear_1, linear_2, relu)).
    """
    B = x.shape[0]
    f32 = jnp.float32

    xt = x.T.astype(f32)                     # (2, B) — layout plumbing only
    bn = _pick_block(B)
    grid = (B // bn,)

    packed = pl.pallas_call(
        _hook_kernel,
        out_shape=jax.ShapeDtypeStruct((5, B), f32),
        grid=grid,
        in_specs=[pl.BlockSpec((2, bn), lambda j: (0, j))],
        out_specs=pl.BlockSpec((5, bn), lambda j: (0, j)),
        compiler_params=pltpu.CompilerParams(
            dimension_semantics=("parallel",)),
    )(xt)

    # Row slices of the (5, B) slab are contiguous, lane-dense copies; the
    # transposes back to module layout are cheap wrapper-side plumbing.
    l1 = packed[0:2, :].T                    # (B, 2)
    l2 = packed[2:3, :].T                    # (B, 1)
    relu = packed[3:4, :].T                  # (B, 1)
    relu6 = packed[4:5, :].T                 # (B, 1)

    layers_in = (x, l1, l2)
    layers_out = (l1, l2, relu)
    return relu6, layers_in, layers_out


if __name__ == "__main__":
    key = jax.random.PRNGKey(0)
    B = 8
    x = jax.random.normal(key, (B, 2), dtype=jnp.float32)

    relu6, layers_in, layers_out = test_for_hook_forward(x)
    jax.block_until_ready((relu6, layers_in, layers_out))

    # Reference check in plain JAX (same deterministic all-ones weights).
    l1_ref = x @ jnp.ones((2, 2), jnp.float32) + 1.0
    l2_ref = l1_ref @ jnp.ones((2, 1), jnp.float32) + 1.0
    relu_ref = jnp.maximum(l2_ref, 0.0)
    relu6_ref = jnp.minimum(relu_ref, 6.0)

    assert jnp.allclose(layers_out[0], l1_ref, atol=1e-5)
    assert jnp.allclose(layers_out[1], l2_ref, atol=1e-5)
    assert jnp.allclose(layers_out[2], relu_ref, atol=1e-5)
    assert jnp.allclose(relu6, relu6_ref, atol=1e-5)
    assert jnp.allclose(layers_in[1], l1_ref, atol=1e-5)
    assert jnp.allclose(layers_in[2], l2_ref, atol=1e-5)

    print("KERNEL_OK")
</pallas_src>

<mosaic_0001>
module attributes {stable_mosaic.version = 11 : i64} {
  func.func @_hook_kernel(%arg0: i32, %arg1: memref<2x8xf32, #tpu.memory_space<vmem>>, %arg2: memref<5x8xf32, #tpu.memory_space<vmem>>) attributes {dimension_semantics = [#tpu.dimension_semantics<parallel>], iteration_bounds = array<i64: 1>, scalar_prefetch = 0 : i64, scratch_operands = 0 : i64, tpu.core_type = #tpu.core_type<tc>, window_params = [{transform_indices = @transform_0, window_bounds = array<i64: 2, 8>}, {transform_indices = @transform_1, window_bounds = array<i64: 5, 8>}]} {
    %c0 = arith.constant 0 : index
    %c0_0 = arith.constant 0 : index
    %0 = vector.load %arg1[%c0, %c0_0] : memref<2x8xf32, #tpu.memory_space<vmem>>, vector<1x8xf32>
    %c1 = arith.constant 1 : index
    %c0_1 = arith.constant 0 : index
    %1 = vector.load %arg1[%c1, %c0_1] : memref<2x8xf32, #tpu.memory_space<vmem>>, vector<1x8xf32>
    %2 = arith.addf %0, %1 : vector<1x8xf32>
    %cst = arith.constant 1.000000e+00 : f32
    %3 = vector.broadcast %cst : f32 to vector<1x8xf32>
    %4 = arith.addf %2, %3 : vector<1x8xf32>
    %5 = arith.addf %4, %4 : vector<1x8xf32>
    %cst_2 = arith.constant 1.000000e+00 : f32
    %6 = vector.broadcast %cst_2 : f32 to vector<1x8xf32>
    %7 = arith.addf %5, %6 : vector<1x8xf32>
    %cst_3 = arith.constant 0.000000e+00 : f32
    %8 = vector.broadcast %cst_3 : f32 to vector<1x8xf32>
    %9 = arith.maximumf %7, %8 : vector<1x8xf32>
    %cst_4 = arith.constant 6.000000e+00 : f32
    %10 = vector.broadcast %cst_4 : f32 to vector<1x8xf32>
    %11 = arith.minimumf %9, %10 : vector<1x8xf32>
    %c0_5 = arith.constant 0 : index
    %c0_6 = arith.constant 0 : index
    %12 = vector.load %arg2[%c0_5, %c0_6] : memref<5x8xf32, #tpu.memory_space<vmem>>, vector<1x8xf32>
    tpu.vector_store %arg2[%c0_5, %c0_6], %4 {strides = array<i32>} : memref<5x8xf32, #tpu.memory_space<vmem>>, vector<1x8xf32>,
    %c1_7 = arith.constant 1 : index
    %c0_8 = arith.constant 0 : index
    %13 = vector.load %arg2[%c1_7, %c0_8] : memref<5x8xf32, #tpu.memory_space<vmem>>, vector<1x8xf32>
    tpu.vector_store %arg2[%c1_7, %c0_8], %4 {strides = array<i32>} : memref<5x8xf32, #tpu.memory_space<vmem>>, vector<1x8xf32>,
    %c2 = arith.constant 2 : index
    %c0_9 = arith.constant 0 : index
    %14 = vector.load %arg2[%c2, %c0_9] : memref<5x8xf32, #tpu.memory_space<vmem>>, vector<1x8xf32>
    tpu.vector_store %arg2[%c2, %c0_9], %7 {strides = array<i32>} : memref<5x8xf32, #tpu.memory_space<vmem>>, vector<1x8xf32>,
    %c3 = arith.constant 3 : index
    %c0_10 = arith.constant 0 : index
    %15 = vector.load %arg2[%c3, %c0_10] : memref<5x8xf32, #tpu.memory_space<vmem>>, vector<1x8xf32>
    tpu.vector_store %arg2[%c3, %c0_10], %9 {strides = array<i32>} : memref<5x8xf32, #tpu.memory_space<vmem>>, vector<1x8xf32>,
    %c4 = arith.constant 4 : index
    %c0_11 = arith.constant 0 : index
    %16 = vector.load %arg2[%c4, %c0_11] : memref<5x8xf32, #tpu.memory_space<vmem>>, vector<1x8xf32>
    tpu.vector_store %arg2[%c4, %c0_11], %11 {strides = array<i32>} : memref<5x8xf32, #tpu.memory_space<vmem>>, vector<1x8xf32>,
    return
  }
  func.func @transform_0(%arg0: i32) -> (i32, i32) {
    %c0_i32 = arith.constant 0 : i32
    %c0_i32_0 = arith.constant 0 : i32
    return %c0_i32, %arg0 : i32, i32
  }
  func.func @transform_1(%arg0: i32) -> (i32, i32) {
    %c0_i32 = arith.constant 0 : i32
    %c0_i32_0 = arith.constant 0 : i32
    return %c0_i32, %arg0 : i32, i32
  }
}

</mosaic_0001>

<bundles_post_ra>
// kernel: tpu_custom_call.1
= control target key start
LH: loop header
LB: loop body
LE: loop exit
PB: predicated region body
PF: predicated region fallthrough
CT: control target
= control target key end

     0   :  { %6 = vsyncpa [#allocation3], 0  ;;  %s126_s0 = inlined_call_operand.hbm [shape: f32[2,8], index: 0, kind: input, shape index: {}]   ;;  %s127_s1 = inlined_call_operand.hbm [shape: f32[5,8], index: 1, kind: output, shape index: {}]  }
   0x1   :  { %7 = vsyncpa [#allocation4], 0  ;;  %s13_s8 = sshll.u32 %s126_s0, 4  ;;  %s108_s9 = smov [#allocation2]   ;;  %s14_s8 = int_to_ptr.hbm [resolvable:$true] %s13_s8 }
   0x2   :  { %s15_s10 = sshll.u32 %s108_s9, 4  ;;  %s16_s10 = int_to_ptr.vmem [resolvable:$true] %s15_s10 }
   0x3   :  { %18 = dma.hbm_to_vmem [thread:$0]  %s14_s8, 32, %s16_s10, [#allocation3]  }
   0x4   :  { %104 = dma.done.wait [#allocation3], 32  }
   0x5   :  { %105 = vsyncadd [#allocation3], 4294967264  ;;  %v23_v0 = vld [vmem:[#allocation2] sm:$0x1]  ;;  %v24_v1 = vld [vmem:[#allocation2 + $0x1] sm:$0x1] }
   0x6   :  { %v25_v2 = vadd.f32 %v24_v1, %v23_v0  ;;  %vm31_vm0 = vcmask 57344   ;;  %s109_s11 = smov [#allocation5]   ;;  %s44_s14 = sshll.u32 %s127_s1, 4  ;;  %s45_s14 = int_to_ptr.hbm [resolvable:$true] %s44_s14 }
   0x7   :  { %s42_s12 = sshll.u32 %s109_s11, 4  ;;  %s43_s12 = int_to_ptr.vmem [resolvable:$true] %s42_s12 }
   0x8   :  { %v26_v3 = vadd.f32 1.0, %v25_v2 }
   0xa   :  { %32 = vst.msk [vmem:[#allocation5] sm:$0x1] %vm31_vm0, %v26_v3  ;;  %v27_v4 = vadd.f32 %v26_v3, %v26_v3 }
   0xb   :  { %33 = vst.msk [vmem:[#allocation5 + $0x1] sm:$0x1] %vm31_vm0, %v26_v3 }
   0xc   :  { %v28_v5 = vadd.f32 1.0, %v27_v4 }
   0xe   :  { %34 = vst.msk [vmem:[#allocation5 + $0x2] sm:$0x1] %vm31_vm0, %v28_v5  ;;  %v29_v6 = vmax.f32 %v28_v5, 0.0 }
  0x10   :  { %35 = vst.msk [vmem:[#allocation5 + $0x3] sm:$0x1] %vm31_vm0, %v29_v6  ;;  %v30_v7 = vmin.f32 %v29_v6, 6.0 }
  0x12   :  { %36 = vst.msk [vmem:[#allocation5 + $0x4] sm:$0x1] %vm31_vm0, %v30_v7 }
  0x13   :  { %47 = dma.vmem_to_hbm [thread:$0]  %s43_s12, 128, %s45_s14, [#allocation4]  }
  0x14   :  { %106 = dma.done.wait [#allocation4], 128  }
  0x15   :  { %107 = vsyncadd [#allocation4], 4294967168 }
  0x16   :  { %52 = vsyncpa [#allocation3], 1 }
  0x17   :  { %53 = vsyncpa [#allocation4], 1 }

</bundles_post_ra>
